<compile_context>
chip_gen: v7x
topology: tpu7x:2x2x1
jax: 0.10.0
libtpu: 0.0.40
codegen_flags: <defaults>
</compile_context>

<pallas_src>
import functools

import jax
import jax.numpy as jnp
from jax.experimental import pallas as pl
from jax.experimental.pallas import tpu as pltpu


def _round_up(x, m):
    return (x + m - 1) // m * m


def _ffn_kernel(x_ref, w1_ref, b1_ref, w2_ref, b2_ref, o_ref, acc_ref):
    """One (token-tile, d_ff-chunk) step of the fused FFN.

    x_ref:  (tm, dmp)     w1_ref: (dmp, t_ff)   b1_ref: (1, t_ff)
    w2_ref: (t_ff, dmp)   b2_ref: (1, dmp)      o_ref:  (tm, dmp)
    acc_ref: (tm, dmp) f32 scratch, resident across the d_ff (k) axis.
    """
    k = pl.program_id(1)

    @pl.when(k == 0)
    def _():
        acc_ref[...] = jnp.zeros_like(acc_ref)

    # First GEMM + bias + ReLU on this d_ff chunk (f32 accumulation on MXU).
    h = jnp.dot(x_ref[...], w1_ref[...], preferred_element_type=jnp.float32)
    h = jnp.maximum(h + b1_ref[...], 0.0)          # ReLU; dropout = identity

    # Second GEMM: accumulate this chunk's contribution (explicit cast keeps
    # the compute dtype under wrapper control, independent of weight storage).
    acc_ref[...] += jnp.dot(h.astype(w2_ref.dtype), w2_ref[...],
                            preferred_element_type=jnp.float32)

    @pl.when(k == pl.num_programs(1) - 1)
    def _():
        o_ref[...] = (acc_ref[...] + b2_ref[...]).astype(o_ref.dtype)


_VMEM_BUDGET = 40 * 1024 * 1024     # conservative: fits v7x's 64 MiB/TC


def _tile_vmem_bytes(tm, t_ff, dmp, compute_itemsize, out_itemsize):
    dbl = 2                                          # BlockSpec double-buffering
    x_b = dbl * tm * dmp * compute_itemsize
    w_b = dbl * 2 * dmp * t_ff * compute_itemsize    # w1 + w2 chunks
    b_b = dbl * 8 * (t_ff + dmp) * 4                 # biases (sublane-padded)
    o_b = dbl * tm * dmp * out_itemsize
    acc = tm * dmp * 4                               # f32 accumulator scratch
    return x_b + w_b + b_b + o_b + acc


@functools.partial(jax.jit, static_argnames=("compute_dtype",))
def poswise_feed_forward(x, w1, b1, w2, b2, *, compute_dtype=None):
    """x: [B, S, d_model] -> [B, S, d_model] (PoswiseFeedForward, eval mode)."""
    B, S, d_model = x.shape
    d_ff = w1.shape[1]
    M = B * S
    cdt = jnp.dtype(compute_dtype) if compute_dtype is not None else x.dtype
    c_item = cdt.itemsize
    o_item = x.dtype.itemsize

    # ---- tile selection: lane/MXU aligned, >=2 token steps when possible ----
    dmp = _round_up(d_model, 128)
    tm = min(512, _round_up(M, 8))
    if tm >= 256 and _round_up(M, tm) // tm < 2:
        tm = _round_up(tm // 2, 8)       # pipelining + v7x dual-TC sharding
    t_ff = min(512, _round_up(d_ff, 128))
    while _tile_vmem_bytes(tm, t_ff, dmp, c_item, o_item) > _VMEM_BUDGET:
        if t_ff > 128:
            t_ff = max(128, (t_ff // 2) // 128 * 128)
        elif tm > 128:
            tm = max(128, _round_up(tm // 2, 8))
        else:
            break
    m_pad = _round_up(M, tm)
    dffp = _round_up(d_ff, t_ff)
    n_m, n_k = m_pad // tm, dffp // t_ff

    # ---- zero-pad to aligned shapes (mathematically inert here) & cast ------
    x_p = jnp.pad(x.reshape(M, d_model),
                  ((0, m_pad - M), (0, dmp - d_model))).astype(cdt)
    w1_p = jnp.pad(w1, ((0, dmp - d_model), (0, dffp - d_ff))).astype(cdt)
    w2_p = jnp.pad(w2, ((0, dffp - d_ff), (0, dmp - d_model))).astype(cdt)
    b1_p = jnp.pad(b1, (0, dffp - d_ff)).reshape(1, dffp).astype(jnp.float32)
    b2_p = jnp.pad(b2, (0, dmp - d_model)).reshape(1, dmp).astype(jnp.float32)

    est = _tile_vmem_bytes(tm, t_ff, dmp, c_item, o_item)
    vmem_limit = int(min(64 * 1024 * 1024, max(2 * est, 16 * 1024 * 1024)))
    cost = pl.CostEstimate(
        flops=4 * M * d_model * d_ff,                 # two GEMMs, 2 flops/MAC
        transcendentals=0,
        bytes_accessed=(x_p.size * c_item + m_pad * dmp * o_item
                        + n_m * (w1_p.size + w2_p.size) * c_item
                        + n_m * (b1_p.size + b2_p.size) * 4),
    )

    out = pl.pallas_call(
        _ffn_kernel,
        out_shape=jax.ShapeDtypeStruct((m_pad, dmp), x.dtype),
        grid_spec=pltpu.PrefetchScalarGridSpec(
            num_scalar_prefetch=0,
            grid=(n_m, n_k),
            in_specs=[
                pl.BlockSpec((tm, dmp), lambda i, k: (i, 0)),      # x tile
                pl.BlockSpec((dmp, t_ff), lambda i, k: (0, k)),    # w1 chunk
                pl.BlockSpec((1, t_ff), lambda i, k: (0, k)),      # b1 chunk
                pl.BlockSpec((t_ff, dmp), lambda i, k: (k, 0)),    # w2 chunk
                pl.BlockSpec((1, dmp), lambda i, k: (0, 0)),       # b2
            ],
            out_specs=pl.BlockSpec((tm, dmp), lambda i, k: (i, 0)),
            scratch_shapes=[pltpu.VMEM((tm, dmp), jnp.float32)],
        ),
        compiler_params=pltpu.CompilerParams(
            dimension_semantics=("parallel", "arbitrary"),
            vmem_limit_bytes=vmem_limit,
        ),
        cost_estimate=cost,
    )(x_p, w1_p, b1_p, w2_p, b2_p)

    return out[:M, :d_model].reshape(B, S, d_model)


def init_params(key, d_model, d_ff, dtype=jnp.float32):
    """nn.Linear-style init (uniform +/- 1/sqrt(fan_in)); weights stored
    (in_features, out_features) so the kernel does x @ W directly."""
    k1, k2, k3, k4 = jax.random.split(key, 4)
    bound1 = 1.0 / (d_model ** 0.5)
    bound2 = 1.0 / (d_ff ** 0.5)
    w1 = jax.random.uniform(k1, (d_model, d_ff), dtype, -bound1, bound1)
    b1 = jax.random.uniform(k2, (d_ff,), dtype, -bound1, bound1)
    w2 = jax.random.uniform(k3, (d_ff, d_model), dtype, -bound2, bound2)
    b2 = jax.random.uniform(k4, (d_model,), dtype, -bound2, bound2)
    return w1, b1, w2, b2


def _reference(x, w1, b1, w2, b2):
    d_model = x.shape[-1]
    h = jnp.maximum(x.reshape(-1, d_model) @ w1 + b1, 0.0)
    return (h @ w2 + b2).reshape(x.shape)


if __name__ == "__main__":
    key = jax.random.PRNGKey(0)
    kx, kp, kx2, kp2 = jax.random.split(key, 4)

    # Lane-/MXU-aligned config (d_model=128, feed_forward_dim=256).
    B, S, d_model, d_ff = 2, 128, 128, 256
    x = jax.random.normal(kx, (B, S, d_model), jnp.float32)
    params = init_params(kp, d_model, d_ff)

    y = jax.block_until_ready(poswise_feed_forward(x, *params))
    y_ref = _reference(x, *params)
    assert y.shape == (B, S, d_model)
    assert jnp.allclose(y, y_ref, atol=1e-4, rtol=1e-4)

    # bf16 matmul operands / f32 accumulation (v6e & v7x MXU peak path).
    y_bf = jax.block_until_ready(
        poswise_feed_forward(x, *params, compute_dtype=jnp.bfloat16))
    assert jnp.allclose(y_bf, y_ref, atol=5e-2, rtol=5e-2)

    # Small/unaligned shapes matching the module's toy config exercise the
    # zero-padding path (d_model=32, feed_forward_dim=64).
    B2, S2, dm2, dff2 = 2, 8, 32, 64
    x2 = jax.random.normal(kx2, (B2, S2, dm2), jnp.float32)
    params2 = init_params(kp2, dm2, dff2)
    y2 = jax.block_until_ready(poswise_feed_forward(x2, *params2))
    assert jnp.allclose(y2, _reference(x2, *params2), atol=1e-4, rtol=1e-4)

    print("KERNEL_OK")
</pallas_src>

<mosaic_0001>
module attributes {stable_mosaic.version = 11 : i64} {
  func.func @_ffn_kernel(%arg0: i32, %arg1: i32, %arg2: memref<128x128xf32, #tpu.memory_space<vmem>>, %arg3: memref<128x256xf32, #tpu.memory_space<vmem>>, %arg4: memref<1x256xf32, #tpu.memory_space<vmem>>, %arg5: memref<256x128xf32, #tpu.memory_space<vmem>>, %arg6: memref<1x128xf32, #tpu.memory_space<vmem>>, %arg7: memref<128x128xf32, #tpu.memory_space<vmem>>, %arg8: memref<128x128xf32, #tpu.memory_space<vmem>>) attributes {dimension_semantics = [#tpu.dimension_semantics<parallel>, #tpu.dimension_semantics<arbitrary>], iteration_bounds = array<i64: 2, 1>, scalar_prefetch = 0 : i64, scratch_operands = 1 : i64, tpu.core_type = #tpu.core_type<tc>, window_params = [{transform_indices = @transform_0, window_bounds = array<i64: 128, 128>}, {transform_indices = @transform_1, window_bounds = array<i64: 128, 256>}, {transform_indices = @transform_2, window_bounds = array<i64: 1, 256>}, {transform_indices = @transform_3, window_bounds = array<i64: 256, 128>}, {pipeline_mode = #tpu.pipeline_mode<synchronous>, transform_indices = @transform_4, window_bounds = array<i64: 1, 128>}, {transform_indices = @transform_5, window_bounds = array<i64: 128, 128>}]} {
    %c0_i32 = arith.constant 0 : i32
    %0 = arith.cmpi eq, %arg1, %c0_i32 : i32
    %1 = arith.extui %0 : i1 to i32
    %c0_i32_0 = arith.constant 0 : i32
    %2 = arith.cmpi ne, %1, %c0_i32_0 : i32
    scf.if %2 {
      %cst_16 = arith.constant 0.000000e+00 : f32
      %19 = vector.broadcast %cst_16 : f32 to vector<128x128xf32>
      %c0_17 = arith.constant 0 : index
      %c0_18 = arith.constant 0 : index
      %20 = vector.load %arg8[%c0_17, %c0_18] : memref<128x128xf32, #tpu.memory_space<vmem>>, vector<128x128xf32>
      tpu.vector_store %arg8[%c0_17, %c0_18], %19 {strides = array<i32>} : memref<128x128xf32, #tpu.memory_space<vmem>>, vector<128x128xf32>,
    } else {
    }
    %c0 = arith.constant 0 : index
    %c0_1 = arith.constant 0 : index
    %3 = vector.load %arg2[%c0, %c0_1] : memref<128x128xf32, #tpu.memory_space<vmem>>, vector<128x128xf32>
    %c0_2 = arith.constant 0 : index
    %c0_3 = arith.constant 0 : index
    %4 = vector.load %arg3[%c0_2, %c0_3] : memref<128x256xf32, #tpu.memory_space<vmem>>, vector<128x256xf32>
    %cst = arith.constant dense<0.000000e+00> : vector<128x256xf32>
    %5 = tpu.matmul %3, %4, %cst {dimension_numbers = #tpu.dot_dimension_numbers<[1], [0], [0], [1], [0, 0, 1, 1], [], []>} : vector<128x128xf32>, vector<128x256xf32>, vector<128x256xf32> -> vector<128x256xf32>
    %c0_4 = arith.constant 0 : index
    %c0_5 = arith.constant 0 : index
    %6 = vector.load %arg4[%c0_4, %c0_5] : memref<1x256xf32, #tpu.memory_space<vmem>>, vector<1x256xf32>
    %7 = vector.broadcast %6 : vector<1x256xf32> to vector<128x256xf32>
    %8 = arith.addf %5, %7 : vector<128x256xf32>
    %cst_6 = arith.constant 0.000000e+00 : f32
    %9 = vector.broadcast %cst_6 : f32 to vector<128x256xf32>
    %10 = arith.maximumf %8, %9 : vector<128x256xf32>
    %c0_7 = arith.constant 0 : index
    %c0_8 = arith.constant 0 : index
    %11 = vector.load %arg8[%c0_7, %c0_8] : memref<128x128xf32, #tpu.memory_space<vmem>>, vector<128x128xf32>
    %c0_9 = arith.constant 0 : index
    %c0_10 = arith.constant 0 : index
    %12 = vector.load %arg5[%c0_9, %c0_10] : memref<256x128xf32, #tpu.memory_space<vmem>>, vector<256x128xf32>
    %cst_11 = arith.constant dense<0.000000e+00> : vector<128x128xf32>
    %13 = tpu.matmul %10, %12, %cst_11 {dimension_numbers = #tpu.dot_dimension_numbers<[1], [0], [0], [1], [0, 0, 1, 1], [], []>} : vector<128x256xf32>, vector<256x128xf32>, vector<128x128xf32> -> vector<128x128xf32>
    %14 = arith.addf %11, %13 : vector<128x128xf32>
    %c0_12 = arith.constant 0 : index
    %c0_13 = arith.constant 0 : index
    %15 = vector.load %arg8[%c0_12, %c0_13] : memref<128x128xf32, #tpu.memory_space<vmem>>, vector<128x128xf32>
    tpu.vector_store %arg8[%c0_12, %c0_13], %14 {strides = array<i32>} : memref<128x128xf32, #tpu.memory_space<vmem>>, vector<128x128xf32>,
    %c0_i32_14 = arith.constant 0 : i32
    %16 = arith.cmpi eq, %arg1, %c0_i32_14 : i32
    %17 = arith.extui %16 : i1 to i32
    %c0_i32_15 = arith.constant 0 : i32
    %18 = arith.cmpi ne, %17, %c0_i32_15 : i32
    scf.if %18 {
      %c0_16 = arith.constant 0 : index
      %c0_17 = arith.constant 0 : index
      %19 = vector.load %arg8[%c0_16, %c0_17] : memref<128x128xf32, #tpu.memory_space<vmem>>, vector<128x128xf32>
      %c0_18 = arith.constant 0 : index
      %c0_19 = arith.constant 0 : index
      %20 = vector.load %arg6[%c0_18, %c0_19] : memref<1x128xf32, #tpu.memory_space<vmem>>, vector<1x128xf32>
      %21 = vector.broadcast %20 : vector<1x128xf32> to vector<128x128xf32>
      %22 = arith.addf %19, %21 : vector<128x128xf32>
      %c0_20 = arith.constant 0 : index
      %c0_21 = arith.constant 0 : index
      %23 = vector.load %arg7[%c0_20, %c0_21] : memref<128x128xf32, #tpu.memory_space<vmem>>, vector<128x128xf32>
      tpu.vector_store %arg7[%c0_20, %c0_21], %22 {strides = array<i32>} : memref<128x128xf32, #tpu.memory_space<vmem>>, vector<128x128xf32>,
    } else {
    }
    return
  }
  func.func @transform_0(%arg0: i32, %arg1: i32) -> (i32, i32) {
    %c0_i32 = arith.constant 0 : i32
    %c0_i32_0 = arith.constant 0 : i32
    return %arg0, %c0_i32 : i32, i32
  }
  func.func @transform_1(%arg0: i32, %arg1: i32) -> (i32, i32) {
    %c0_i32 = arith.constant 0 : i32
    %c0_i32_0 = arith.constant 0 : i32
    return %c0_i32, %arg1 : i32, i32
  }
  func.func @transform_2(%arg0: i32, %arg1: i32) -> (i32, i32) {
    %c0_i32 = arith.constant 0 : i32
    %c0_i32_0 = arith.constant 0 : i32
    return %c0_i32, %arg1 : i32, i32
  }
  func.func @transform_3(%arg0: i32, %arg1: i32) -> (i32, i32) {
    %c0_i32 = arith.constant 0 : i32
    %c0_i32_0 = arith.constant 0 : i32
    return %arg1, %c0_i32 : i32, i32
  }
  func.func @transform_4(%arg0: i32, %arg1: i32) -> (i32, i32) {
    %c0_i32 = arith.constant 0 : i32
    %c0_i32_0 = arith.constant 0 : i32
    %c0_i32_1 = arith.constant 0 : i32
    return %c0_i32, %c0_i32_0 : i32, i32
  }
  func.func @transform_5(%arg0: i32, %arg1: i32) -> (i32, i32) {
    %c0_i32 = arith.constant 0 : i32
    %c0_i32_0 = arith.constant 0 : i32
    return %arg0, %c0_i32 : i32, i32
  }
}

</mosaic_0001>

<bundles_post_ra>
// kernel: poswise_feed_forward.1
= control target key start
LH: loop header
LB: loop body
LE: loop exit
PB: predicated region body
PF: predicated region fallthrough
CT: control target
= control target key end

     0   :  { %10 = vsyncpa [#allocation4], 0  ;;  %s1859_s0 = inlined_call_operand.hbm [shape: f32[256,128], index: 0, kind: input, shape index: {}]   ;;  %s1860_s1 = inlined_call_operand.hbm [shape: f32[128,256], index: 1, kind: input, shape index: {}]   ;;  %s1861_s2 = inlined_call_operand.vmem [shape: f32[1,256], index: 2, kind: input, shape index: {}]   ;;  %s1862_s3 = inlined_call_operand.hbm [shape: f32[256,128], index: 3, kind: input, shape index: {}]   ;;  %s1863_s4 = inlined_call_operand.vmem [shape: f32[1,128], index: 4, kind: input, shape index: {}]   ;;  %s1864_s5 = inlined_call_operand.hbm [shape: f32[256,128], index: 5, kind: output, shape index: {}]  }
   0x1   :  { %12 = vsyncpa [#allocation4 + $0x1], 0 }
   0x2   :  { %13 = vsyncpa [#allocation7], 0 }
   0x3   :  { %14 = vsyncpa [#allocation5], 0 }
   0x4   :  { %16 = vsyncpa [#allocation5 + $0x1], 0  ;;  %s1481_s18 = smov 0   ;;  %s1483_s19 = smov 0  }
   0x5   :  { %s1485_s20 = smov 0   ;;  %s1487_s21 = smov 0  }
   0x6   :  { %s1489_s22 = smov 0   ;;  %s1491_s23 = smov 0  }
   0x7 LB: > { %s1009_s24 = sadd.s32 4294967295, %s1438_s23   ;;  %s1010_s25 = sadd.s32 4294967294, %s1438_s23   ;;  %s1438_s23 = sphi %s1491_s23, %s22_s23   ;;  %s1434_s22 = sphi %s1489_s22, %s1888_s22   ;;  %s1430_s21 = sphi %s1487_s21, %s1887_s21   ;;  %s1426_s20 = sphi %s1485_s20, %s1886_s20   ;;  %s1422_s19 = sphi %s1483_s19, %s1885_s19   ;;  %s1418_s18 = sphi %s1481_s18, %s1884_s18  }
   0x8   : > { %p54_p0 = scmp.ne.s32.totalorder %s1422_s19, %s1418_s18  ;;  %p1515_p1 = scmp.eq.s32.totalorder %s1009_s24, 0 }
   0x9   : > { %p1519_p2 = scmp.eq.s32.totalorder %s1009_s24, 1  ;;  %p183_p3 = scmp.eq.s32.totalorder %s1010_s25, 1 }
   0xa   : > { %s1870_s26 = scalar_select %p1515_p1, 1, 0 }
   0xb   : > { %p1525_p4 = por %p1515_p1, %p54_p0  ;;  %p1011_p5 = scmp.ge.s32.totalorder %s1438_s23, 1 }
   0xc   : > { %p1530_p6 = por %p183_p3, %p54_p0  ;;  %p190_p7 = scmp.lt.s32.totalorder %s1438_s23, 3 }
   0xd   : > { %s1872_s28 = scalar_select %p1525_p4, 1, 0 }
   0xe   : > { %s1873_s29 = scalar_select %p1530_p6, 1, 0 }
   0xf   : > { %p1535_p8 = pnand %p1011_p5, %p190_p7  ;;  %s1440_s6 = smov [#allocation6]  }
  0x10   : > { %s205_s7 = sshll.u32 %s1440_s6, 4  ;;  %s1441_s9 = smov [#allocation8]   ;;  %s1539_s7 = int_to_ptr.vmem [resolvable:$true] %s205_s7 }
  0x11   : > { %p1188_p9 = pneg %p1535_p8  ;;  %s229_s10 = sshll.u32 %s1441_s9, 4  ;;  %s1550_s10 = int_to_ptr.vmem [resolvable:$true] %s229_s10 }
  0x12   : > { %s1266_s13 = scalar_lea.hbm %s1860_s1, 4096 }
  0x13   : > { %p1546_p11 = pnand %p1188_p9, %p1515_p1  ;;  %p1267_p12 = scmp.ne.s32.totalorder %s1860_s1, %s1266_s13 }
  0x14   : > { %p1273_p5 = scmp.lt.u32.totalorder %s1266_s13, %s1860_s1 }
  0x15   : > { %p1268_p13 = pneg %p1546_p11 }
  0x17   : > { %p1269_p0 = pnand %p1268_p13, %p1267_p12 }
  0x19   : > { %p1270_p3 = pneg %p1269_p0 }
  0x1b   : > { %p1275_p7 = pnand %p1273_p5, %p1270_p3 }
  0x1d   : > { %1278 = shalt.err (!%p1275_p7)
}
  0x1e   : > { %s1279_s24 = scalar_lea.vmem %s1539_s7, 4096  ;;  %p1287_p1 = scmp.lt.s32.totalorder %s1539_s7, %s1539_s7 }
  0x1f   : > { %p1280_p9 = scmp.ne.s32.totalorder %s1539_s7, %s1279_s24  ;;  %p1288_p12 = scmp.lt.s32.totalorder %s1279_s24, %s1279_s24 }
  0x21   : > { %p1282_p10 = pnand %p1280_p9, %p1268_p13  ;;  %p1289_p0 = por %p1288_p12, %p1287_p1 }
  0x23   : > { %p1283_p6 = pneg %p1282_p10 }
  0x25   : > { %p1290_p4 = pnand %p1289_p0, %p1283_p6 }
  0x27   : > { %1293 = shalt.err (!%p1290_p4)
}
  0x28   : > { %s1442_s25 = smov 256   ;;  %s1443_s6 = smov 16  }
  0x29   : > { %1191 = dma.hbm_to_vmem [thread:$0]  (!%p1546_p11), %s1860_s1, 4096, %s1539_s7, [#allocation7], %s1442_s25, %s1442_s25, %s1443_s6  }
  0x2a   : > { %s1294_s14 = scalar_lea.hbm %s1862_s3, 4096 }
  0x2b   : > { %p1295_p1 = scmp.ne.s32.totalorder %s1862_s3, %s1294_s14  ;;  %p1301_p10 = scmp.lt.u32.totalorder %s1294_s14, %s1862_s3 }
  0x2d   : > { %p1297_p4 = pnand %p1295_p1, %p1268_p13 }
  0x2f   : > { %p1298_p6 = pneg %p1297_p4 }
  0x31   : > { %p1303_p3 = pnand %p1301_p10, %p1298_p6 }
  0x33   : > { %1306 = shalt.err (!%p1303_p3)
}
  0x34   : > { %s1307_s7 = scalar_lea.vmem %s1550_s10, 4096  ;;  %p1315_p12 = scmp.lt.s32.totalorder %s1550_s10, %s1550_s10 }
  0x35   : > { %p1308_p5 = scmp.ne.s32.totalorder %s1550_s10, %s1307_s7  ;;  %p1316_p0 = scmp.lt.s32.totalorder %s1307_s7, %s1307_s7 }
  0x37   : > { %p1310_p7 = pnand %p1308_p5, %p1268_p13  ;;  %p1317_p1 = por %p1316_p0, %p1315_p12 }
  0x39   : > { %p1311_p9 = pneg %p1310_p7 }
  0x3b   : > { %p1318_p4 = pnand %p1317_p1, %p1311_p9 }
  0x3d   : > { %1321 = shalt.err (!%p1318_p4)
}
  0x3e   : > { %s1868_s25 = smov 128   ;;  %s1445_s6 = smov 8  }
  0x3f   : > { %1194 = dma.hbm_to_vmem [thread:$0]  (!%p1546_p11), %s1862_s3, 4096, %s1550_s10, [#allocation7], %s1868_s25, %s1868_s25, %s1445_s6  }
  0x40   : > { %s34_s12 = sadd.s32 1, %s1434_s22  ;;  %s41_s13 = sadd.s32 1, %s1426_s20 }
  0x41   : > { %p36_p13 = scmp.ge.s32.totalorder %s34_s12, 2  ;;  %p48_p6 = scmp.ne.s32.totalorder %s1426_s20, %s1422_s19 }
  0x42   : > { %p49_p10 = scmp.eq.s32.totalorder %s1438_s23, 0  ;;  %p1205_p3 = scmp.lt.s32.totalorder %s1438_s23, 2 }
  0x43   : > { %s1890_s12 = smov (%p36_p13, %s34_s12), 0  ;;  %p1617_p7 = por %p1519_p2, %p48_p6 }
  0x44   : > { %p50_p5 = por %p49_p10, %p48_p6  ;;  %s38_s14 = ssub.s32 %s1434_s22, %s1890_s12 }
  0x45   : > { %s1876_s8 = scalar_select %p1617_p7, 1, 0 }
  0x46   : > { %s246_s15 = sand.u32 1, %s1426_s20   ;;  %p39_p9 = scmp.eq.s32.totalorder %s38_s14, 0 }
  0x47   : > { %s1016_s10 = sshll.u32 %s246_s15, 7  ;;  %s1030_s16 = sshll.u32 %s1434_s22, 11 }
  0x48   : > { %s1626_s17 = scalar_select %p39_p9, %s1426_s20, %s41_s13  }
  0x49   : > { %s1631_s9 = scalar_lea.hbm %s1859_s0, %s1030_s16  ;;  %s250_s27 = scalar_lea.vmem [#allocation3], %s1016_s10 }
  0x4a   : > { %s257_s11 = sshll.u32 %s250_s27, 4  ;;  %p1635_p2 = pnand %p1205_p3, %p50_p5  ;;  %s1639_s11 = int_to_ptr.vmem [resolvable:$true] %s257_s11 }
  0x4b   : > { %s1641_s13 = scalar_lea.sflag [#allocation4], %s246_s15  ;;  %s1322_s14 = scalar_lea.hbm %s1631_s9, 2048 }
  0x4c   : > { %p1323_p11 = scmp.ne.s32.totalorder %s1631_s9, %s1322_s14  ;;  %p1324_p12 = pneg %p1635_p2 }
  0x4d   : > { %s1327_s24 = scalar_lea.hbm %s1859_s0, 4096  ;;  %p1328_p4 = scmp.lt.u32.totalorder %s1631_s9, %s1859_s0 }
  0x4e   : > { %p1325_p0 = pnand %p1324_p12, %p1323_p11  ;;  %p1329_p13 = scmp.lt.u32.totalorder %s1327_s24, %s1322_s14 }
  0x4f   : > { %p1331_p10 = scmp.lt.u32.totalorder %s1322_s14, %s1631_s9 }
  0x50   : > { %p1326_p1 = pneg %p1325_p0  ;;  %p1330_p6 = por %p1329_p13, %p1328_p4 }
  0x52   : > { %p1332_p3 = por %p1331_p10, %p1330_p6 }
  0x54   : > { %p1333_p5 = pnand %p1332_p3, %p1326_p1 }
  0x56   : > { %1336 = shalt.err (!%p1333_p5)
}
  0x57   : > { %s1337_s15 = scalar_lea.vmem %s1639_s11, 2048  ;;  %s1446_s10 = smov [#allocation3]  }
  0x58   : > { %p1338_p9 = scmp.ne.s32.totalorder %s1639_s11, %s1337_s15  ;;  %s1342_s16 = sshll.u32 %s1446_s10, 4  ;;  %s1343_s16 = int_to_ptr.vmem [resolvable:$false] %s1342_s16 }
  0x59   : > { %s1344_s7 = scalar_lea.vmem %s1343_s16, 4096  ;;  %p1345_p7 = scmp.lt.s32.totalorder %s1639_s11, %s1343_s16 }
  0x5a   : > { %p1340_p11 = pnand %p1338_p9, %p1324_p12  ;;  %p1346_p4 = scmp.lt.s32.totalorder %s1344_s7, %s1337_s15 }
  0x5c   : > { %p1341_p0 = pneg %p1340_p11  ;;  %p1347_p13 = por %p1346_p4, %p1345_p7 }
  0x5e   : > { %p1348_p6 = pnand %p1347_p13, %p1341_p0 }
  0x60   : > { %1351 = shalt.err (!%p1348_p6)
}
  0x61   : > { %s1878_s14 = smov 128   ;;  %269 = sbr.rel (%p1535_p8) target bundleno = 653 (0x28d), region = 40 }
  0x62   : > { %1198 = dma.hbm_to_vmem [thread:$0]  (!%p1635_p2), %s1631_s9, 2048, %s1639_s11, %s1641_s13, %s1878_s14, %s1878_s14, %s1445_s6  }
  0x63   : > { %s1675_s24 = sand.u32 (!%p1535_p8), 1, %s1422_s19   ;;  %p1879_p7 = scmp.ne.s32.totalorder (!%p1535_p8), %s1872_s28, 0 }
  0x64   : > { %s1020_s27 = sshll.u32 (!%p1535_p8), %s1675_s24, 7  ;;  %s272_s15 = scalar_lea.sflag (!%p1535_p8), [#allocation4], %s1675_s24 }
  0x65   : > { %s1681_s25 = scalar_lea.vmem (!%p1535_p8), [#allocation3], %s1020_s27 }
  0x68   : > { %1405 = dma.done.wait (%p1879_p7), %s272_s15, 2048  }
  0x69   : > { %1407 = vsyncadd (%p1879_p7), %s272_s15, 4294965248  ;;  %p1880_p2 = scmp.ne.s32.totalorder %s1870_s26, 0 }
  0x6b   : > { %1409 = dma.done.wait (%p1880_p2), [#allocation7], 8192  }
  0x6c   : > { %1411 = vsyncadd (%p1880_p2), [#allocation7], 4294959104  ;;  %v1447_v0 = vmov 0.0   ;;  %v360_v1 = vld [vmem:[#allocation6 + $0x8] sm:$0xff]  ;;  %v362_v2 = vld [vmem:[#allocation6 + $0x18] sm:$0xff]  ;;  %s1770_s9 = scalar_lea.vmem [#allocation9], %s1020_s27 }
  0x6d   : > { %467 = vmatprep.mubr.f32.mxu0 %v1447_v0  ;;  %v359_v3 = vld [vmem:[#allocation6] sm:$0xff]  ;;  %v1112_v4 = vpack.c.bf16 %v362_v2, %v360_v1  ;;  %v361_v5 = vld [vmem:[#allocation6 + $0x10] sm:$0xff]  ;;  %v364_v6 = vld [vmem:[#allocation6 + $0x28] sm:$0xff]  ;;  %s1031_s11 = sshll.u32 %s1430_s21, 11  ;;  %s893_s13 = sshll.u32 %s1770_s9, 4  ;;  %s1808_s13 = int_to_ptr.vmem [resolvable:$true] %s893_s13 }
  0x6e   : > { %v366_v7 = vld [vmem:[#allocation6 + $0x38] sm:$0xff]  ;;  %v1114_v8 = vpack.c.bf16 %v361_v5, %v359_v3  ;;  %v363_v10 = vld [vmem:[#allocation6 + $0x20] sm:$0xff]  ;;  %v365_v11 = vld [vmem:[#allocation6 + $0x30] sm:$0xff]  ;;  %s1806_s7 = scalar_lea.hbm %s1864_s5, %s1031_s11  ;;  %s880_s14 = scalar_lea.sflag [#allocation5], %s1675_s24 }
  0x6f   : > { %v1116_v9 = vpack.c.bf16 %v366_v7, %v364_v6  ;;  %v368_v12 = vld [vmem:[#allocation6 + $0x48] sm:$0xff]  ;;  %1113 = vmatprep.subr.bf16.mxu0 %v1112_v4  ;;  %v370_v13 = vld [vmem:[#allocation6 + $0x58] sm:$0xff]  ;;  %v1118_v14 = vpack.c.bf16 %v365_v11, %v363_v10  ;;  %v367_v16 = vld [vmem:[#allocation6 + $0x40] sm:$0xff]  ;;  %s1352_s27 = scalar_lea.vmem %s1808_s13, 2048  ;;  %p1881_p12 = scmp.ne.s32.totalorder %s1876_s8, 0 }
  0x70   : > { %1115 = vmatpush1.bf16.msra.mxu0 %v1114_v8  ;;  %v1120_v15 = vpack.c.bf16 %v370_v13, %v368_v12  ;;  %v369_v17 = vld [vmem:[#allocation6 + $0x50] sm:$0xff]  ;;  %v372_v18 = vld [vmem:[#allocation6 + $0x68] sm:$0xff]  ;;  %v374_v19 = vld [vmem:[#allocation6 + $0x78] sm:$0xff]  ;;  %p1353_p8 = scmp.ne.s32.totalorder %s1808_s13, %s1352_s27  ;;  %s1448_s21 = smov [#allocation9]  }
  0x71   : > { %1117 = vmatprep.subr.bf16.mxu0 %v1116_v9  ;;  %v1122_v20 = vpack.c.bf16 %v369_v17, %v367_v16  ;;  %v1124_v21 = vpack.c.bf16 %v374_v19, %v372_v18  ;;  %v371_v22 = vld [vmem:[#allocation6 + $0x60] sm:$0xff]  ;;  %v373_v23 = vld [vmem:[#allocation6 + $0x70] sm:$0xff]  ;;  %v376_v24 = vld [vmem:[#allocation6 + $0x88] sm:$0xff]  ;;  %s1356_s15 = sshll.u32 %s1448_s21, 4  ;;  %s1357_s15 = int_to_ptr.vmem [resolvable:$false] %s1356_s15 }
  0x72   : > { %v378_v25 = vld [vmem:[#allocation6 + $0x98] sm:$0xff]  ;;  %v1126_v26 = vpack.c.bf16 %v373_v23, %v371_v22  ;;  %v375_v28 = vld [vmem:[#allocation6 + $0x80] sm:$0xff]  ;;  %v377_v29 = vld [vmem:[#allocation6 + $0x90] sm:$0xff]  ;;  %p1354_p1 = pnand %p1353_p8, %p1881_p12  ;;  %p1359_p3 = scmp.lt.s32.totalorder %s1808_s13, %s1357_s15 }
  0x73   : > { %v1128_v27 = vpack.c.bf16 %v378_v25, %v376_v24  ;;  %v380_v30 = vld [vmem:[#allocation6 + $0xa8] sm:$0xff]  ;;  %v382_v31 = vld [vmem:[#allocation6 + $0xb8] sm:$0xff]  ;;  %v379_v32 = vld [vmem:[#allocation6 + $0xa0] sm:$0xff]  ;;  %v1130_v34 = vpack.c.bf16 %v377_v29, %v375_v28 }
  0x74   : > { %1119 = vmatpush1.bf16.msra.mxu0 %v1118_v14  ;;  %v381_v33 = vld [vmem:[#allocation6 + $0xb0] sm:$0xff]  ;;  %v384_v35 = vld [vmem:[#allocation6 + $0xc8] sm:$0xff]  ;;  %v386_v36 = vld [vmem:[#allocation6 + $0xd8] sm:$0xff]  ;;  %v1132_v40 = vpack.c.bf16 %v382_v31, %v380_v30  ;;  %p1355_p10 = pneg %p1354_p1 }
  0x75   : > { %1121 = vmatprep.subr.bf16.mxu0 %v1120_v15  ;;  %v628_v37 = vld [vmem:[#allocation8 + $0x80] sm:$0xff]  ;;  %v629_v38 = vld [vmem:[#allocation8 + $0x88] sm:$0xff]  ;;  %v630_v43 = vld [vmem:[#allocation8 + $0x90] sm:$0xff]  ;;  %v1134_v51 = vpack.c.bf16 %v381_v33, %v379_v32  ;;  %v1136_v55 = vpack.c.bf16 %v386_v36, %v384_v35 }
  0x76   : > { %v612_v39 = vld [vmem:[#allocation8] sm:$0xff]  ;;  %v1144_v41 = vpack.c.bf16 %v629_v38, %v628_v37  ;;  %v613_v42 = vld [vmem:[#allocation8 + $0x8] sm:$0xff]  ;;  %v631_v44 = vld [vmem:[#allocation8 + $0x98] sm:$0xff] }
  0x77   : > { %v1146_v45 = vpack.c.bf16 %v613_v42, %v612_v39  ;;  %v1148_v46 = vpack.c.bf16 %v631_v44, %v630_v43  ;;  %v614_v47 = vld [vmem:[#allocation8 + $0x10] sm:$0xff]  ;;  %v615_v48 = vld [vmem:[#allocation8 + $0x18] sm:$0xff]  ;;  %v632_v49 = vld [vmem:[#allocation8 + $0xa0] sm:$0xff] }
  0x78   : > { %1123 = vmatpush1.bf16.msra.mxu0 %v1122_v20  ;;  %1145 = vmatprep.subr.bf16.mxu1 %v1144_v41  ;;  %v633_v50 = vld [vmem:[#allocation8 + $0xa8] sm:$0xff]  ;;  %v383_v52 = vld [vmem:[#allocation6 + $0xc0] sm:$0xff]  ;;  %v385_v53 = vld [vmem:[#allocation6 + $0xd0] sm:$0xff]  ;;  %v1150_v54 = vpack.c.bf16 %v615_v48, %v614_v47 }
  0x79   : > { %1125 = vmatprep.subr.bf16.mxu0 %v1124_v21  ;;  %1147 = vmatpush3.bf16.msra.mxu1 %v1146_v45  ;;  %v388_v56 = vld [vmem:[#allocation6 + $0xe8] sm:$0xff]  ;;  %v1152_v57 = vpack.c.bf16 %v633_v50, %v632_v49  ;;  %v616_v58 = vld [vmem:[#allocation8 + $0x20] sm:$0xff]  ;;  %v390_v60 = vld [vmem:[#allocation6 + $0xf8] sm:$0xff]  ;;  %v1138_v63 = vpack.c.bf16 %v385_v53, %v383_v52  ;;  %v393_v50 = vlaneseq }
  0x7a   : > { %1149 = vmatprep.subr.bf16.mxu1 %v1148_v46  ;;  %v617_v59 = vld [vmem:[#allocation8 + $0x28] sm:$0xff]  ;;  %v634_v61 = vld [vmem:[#allocation8 + $0xb0] sm:$0xff]  ;;  %v635_v62 = vld [vmem:[#allocation8 + $0xb8] sm:$0xff]  ;;  %v1140_v3 = vpack.c.bf16 %v390_v60, %v388_v56 }
  0x7b   : > { %v387_v1 = vld [vmem:[#allocation6 + $0xe0] sm:$0xff]  ;;  %v1154_v2 = vpack.c.bf16 %v617_v59, %v616_v58  ;;  %v389_v4 = vld [vmem:[#allocation6 + $0xf0] sm:$0xff]  ;;  %v1156_v5 = vpack.c.bf16 %v635_v62, %v634_v61  ;;  %v619_v7 = vld [vmem:[#allocation8 + $0x38] sm:$0xff] }
  0x7c   : > { %1127 = vmatpush1.bf16.msra.mxu0 %v1126_v26  ;;  %v618_v6 = vld [vmem:[#allocation8 + $0x30] sm:$0xff]  ;;  %v636_v8 = vld [vmem:[#allocation8 + $0xc0] sm:$0xff]  ;;  %v637_v9 = vld [vmem:[#allocation8 + $0xc8] sm:$0xff]  ;;  %v1142_v10 = vpack.c.bf16 %v389_v4, %v387_v1 }
  0x7d   : > { %1129 = vmatprep.subr.bf16.mxu0 %v1128_v27  ;;  %1151 = vmatpush3.bf16.msra.mxu1 %v1150_v54  ;;  %v1158_v11 = vpack.c.bf16 %v619_v7, %v618_v6  ;;  %v1160_v12 = vpack.c.bf16 %v637_v9, %v636_v8  ;;  %v620_v13 = vld [vmem:[#allocation8 + $0x40] sm:$0xff]  ;;  %v621_v14 = vld [vmem:[#allocation8 + $0x48] sm:$0xff]  ;;  %v638_v15 = vld [vmem:[#allocation8 + $0xd0] sm:$0xff] }
  0x7e   : > { %1153 = vmatprep.subr.bf16.mxu1 %v1152_v57  ;;  %v639_v16 = vld [vmem:[#allocation8 + $0xd8] sm:$0xff]  ;;  %v343_v17 = vld [vmem:[%s1681_s25] sm:$0xff]  ;;  %v1162_v18 = vpack.c.bf16 %v621_v14, %v620_v13  ;;  %v622_v20 = vld [vmem:[#allocation8 + $0x50] sm:$0xff] }
  0x7f   : > { %v1164_v19 = vpack.c.bf16 %v639_v16, %v638_v15  ;;  %v623_v21 = vld [vmem:[#allocation8 + $0x58] sm:$0xff]  ;;  %v640_v22 = vld [vmem:[#allocation8 + $0xe0] sm:$0xff]  ;;  %v641_v23 = vld [vmem:[#allocation8 + $0xe8] sm:$0xff] }
  0x80   : > { %1131 = vmatpush1.bf16.msra.mxu0 %v1130_v34  ;;  %v344_v24 = vld [vmem:[%s1681_s25 + $0x8] sm:$0xff]  ;;  %v1166_v25 = vpack.c.bf16 %v623_v21, %v622_v20  ;;  %v1168_v26 = vpack.c.bf16 %v641_v23, %v640_v22  ;;  %v345_v27 = vld [vmem:[%s1681_s25 + $0x10] sm:$0xff]  ;;  %v346_v28 = vld [vmem:[%s1681_s25 + $0x18] sm:$0xff] }
  0x81   : > { %1133 = vmatprep.subr.bf16.mxu0 %v1132_v40  ;;  %1155 = vmatpush3.bf16.msra.mxu1 %v1154_v2  ;;  %v347_v29 = vld [vmem:[%s1681_s25 + $0x20] sm:$0xff]  ;;  %v348_v30 = vld [vmem:[%s1681_s25 + $0x28] sm:$0xff]  ;;  %v349_v31 = vld [vmem:[%s1681_s25 + $0x30] sm:$0xff] }
  0x82   : > { %1157 = vmatprep.subr.bf16.mxu1 %v1156_v5  ;;  %v350_v32 = vld [vmem:[%s1681_s25 + $0x38] sm:$0xff]  ;;  %v351_v33 = vld [vmem:[%s1681_s25 + $0x40] sm:$0xff]  ;;  %v352_v34 = vld [vmem:[%s1681_s25 + $0x48] sm:$0xff] }
  0x83   : > { %v353_v35 = vld [vmem:[%s1681_s25 + $0x50] sm:$0xff]  ;;  %v354_v36 = vld [vmem:[%s1681_s25 + $0x58] sm:$0xff]  ;;  %v355_v37 = vld [vmem:[%s1681_s25 + $0x60] sm:$0xff] }
  0x84   : > { %1135 = vmatpush1.bf16.msra.mxu0 %v1134_v51  ;;  %v356_v38 = vld [vmem:[%s1681_s25 + $0x68] sm:$0xff]  ;;  %v357_v39 = vld [vmem:[%s1681_s25 + $0x70] sm:$0xff]  ;;  %v358_v40 = vld [vmem:[%s1681_s25 + $0x78] sm:$0xff]  ;;  %v394_v51 = vshrl.u32 %v393_v50, 7  ;;  %s1358_s25 = scalar_lea.vmem %s1357_s15, 4096 }
  0x85   : > { %1137 = vmatprep.subr.bf16.mxu0 %v1136_v55  ;;  %1159 = vmatpush3.bf16.msra.mxu1 %v1158_v11  ;;  %v624_v41 = vld [vmem:[#allocation8 + $0x60] sm:$0xff]  ;;  %v625_v42 = vld [vmem:[#allocation8 + $0x68] sm:$0xff]  ;;  %v642_v44 = vld [vmem:[#allocation8 + $0xf0] sm:$0xff]  ;;  %p1360_p5 = scmp.lt.s32.totalorder %s1358_s25, %s1352_s27 }
  0x86   : > { %1161 = vmatprep.subr.bf16.mxu1 %v1160_v12  ;;  %v1170_v43 = vpack.c.bf16 %v625_v42, %v624_v41  ;;  %v643_v45 = vld [vmem:[#allocation8 + $0xf8] sm:$0xff]  ;;  %v626_v47 = vld [vmem:[#allocation8 + $0x70] sm:$0xff]  ;;  %v395_v52 = vsub.s32 0, %v394_v51  ;;  %v399_v53 = vsub.s32 1, %v394_v51 }
  0x87   : > { %v1172_v46 = vpack.c.bf16 %v643_v45, %v642_v44  ;;  %v627_v48 = vld [vmem:[#allocation8 + $0x78] sm:$0xff]  ;;  %p1361_p9 = por %p1360_p5, %p1359_p3 }
  0x88   : > { %1139 = vmatpush1.bf16.msra.mxu0 %v1138_v63  ;;  %v1174_v49 = vpack.c.bf16 %v627_v48, %v626_v47 }
  0x89   : > { %1141 = vmatprep.subr.bf16.mxu0 %v1140_v3  ;;  %1163 = vmatpush3.bf16.msra.mxu1 %v1162_v18  ;;  %p1362_p11 = pnand %p1361_p9, %p1355_p10 }
  0x8a   : > { %1165 = vmatprep.subr.bf16.mxu1 %v1164_v19 }
  0x8c   : > { %1143 = vmatpush1.bf16.msra.mxu0 %v1142_v10 }
  0x8d   : > { %1167 = vmatpush3.bf16.msra.mxu1 %v1166_v25 }
  0x8e   : > { %1169 = vmatprep.subr.bf16.mxu1 %v1168_v26 }
  0x8f   : > { %468 = vmatmul.mubr.f32.vlgmr.msra.gmra.mrb[0].mxu0 %v343_v17 }
  0x90   : > { %473 = vmatprep.mubr.f32.mxu0 %v1447_v0 }
  0x91   : > { %1171 = vmatpush3.bf16.msra.mxu1 %v1170_v43 }
  0x92   : > { %1173 = vmatprep.subr.bf16.mxu1 %v1172_v46 }
  0x93   : > { %474 = vmatmul.mubr.f32.gmra.mrb[2].mxu0 %v344_v24 }
  0x94   : > { %479 = vmatprep.mubr.f32.mxu0 %v1447_v0 }
  0x95   : > { %1175 = vmatpush3.bf16.msra.mxu1 %v1174_v49 }
  0x97   : > { %480 = vmatmul.mubr.f32.gmra.mrb[4].mxu0 %v345_v27 }
  0x98   : > { %485 = vmatprep.mubr.f32.mxu0 %v1447_v0 }
  0x9b   : > { %486 = vmatmul.mubr.f32.gmra.mrb[6].mxu0 %v346_v28 }
  0x9c   : > { %491 = vmatprep.mubr.f32.mxu0 %v1447_v0 }
  0x9f   : > { %492 = vmatmul.mubr.f32.gmra.mrb[8].mxu0 %v347_v29 }
  0xa0   : > { %497 = vmatprep.mubr.f32.mxu0 %v1447_v0 }
  0xa3   : > { %498 = vmatmul.mubr.f32.gmra.mrb[10].mxu0 %v348_v30 }
  0xa4   : > { %503 = vmatprep.mubr.f32.mxu0 %v1447_v0 }
  0xa7   : > { %504 = vmatmul.mubr.f32.gmra.mrb[12].mxu0 %v349_v31 }
  0xa8   : > { %509 = vmatprep.mubr.f32.mxu0 %v1447_v0 }
  0xab   : > { %510 = vmatmul.mubr.f32.gmra.mrb[14].mxu0 %v350_v32 }
  0xac   : > { %515 = vmatprep.mubr.f32.mxu0 %v1447_v0 }
  0xaf   : > { %516 = vmatmul.mubr.f32.gmra.mrb[16].mxu0 %v351_v33 }
  0xb0   : > { %521 = vmatprep.mubr.f32.mxu0 %v1447_v0 }
  0xb3   : > { %522 = vmatmul.mubr.f32.gmra.mrb[18].mxu0 %v352_v34 }
  0xb4   : > { %527 = vmatprep.mubr.f32.mxu0 %v1447_v0 }
  0xb7   : > { %528 = vmatmul.mubr.f32.gmra.mrb[20].mxu0 %v353_v35 }
  0xb8   : > { %533 = vmatprep.mubr.f32.mxu0 %v1447_v0 }
  0xbb   : > { %534 = vmatmul.mubr.f32.gmra.mrb[22].mxu0 %v354_v36 }
  0xbc   : > { %539 = vmatprep.mubr.f32.mxu0 %v1447_v0 }
  0xbf   : > { %540 = vmatmul.mubr.f32.gmra.mrb[24].mxu0 %v355_v37 }
  0xc0   : > { %545 = vmatprep.mubr.f32.mxu0 %v1447_v0 }
  0xc3   : > { %546 = vmatmul.mubr.f32.gmra.mrb[26].mxu0 %v356_v38 }
  0xc4   : > { %551 = vmatprep.mubr.f32.mxu0 %v1447_v0 }
  0xc7   : > { %552 = vmatmul.mubr.f32.gmra.mrb[28].mxu0 %v357_v39 }
  0xc8   : > { %557 = vmatprep.mubr.f32.mxu0 %v1447_v0  ;;  %v391_v0 = vld [vmem:[%s1861_s2] sm:$0x3] }
  0xc9   : > { %v1726_v54 = vrot.slane %v391_v0, %v395_v52  ;;  %v1728_v55 = vrot.slane %v391_v0, %v399_v53 }
  0xcb   : > { %558 = vmatmul.mubr.f32.gmra.mrb[30].mxu0 %v358_v40 }
 0x162   : > { %v469_v56 = vpop.f32.mrb[0].mxu0 }
 0x163   : > { %v470_v57 = vadd.f32 %v469_v56, %v1726_v54  ;;  %v471_v58 = vpop.f32.mrb[1].mxu0 }
 0x164   : > { %v472_v59 = vadd.f32 %v471_v58, %v1728_v55 }
 0x165   : > { %v564_v62 = vmax.f32 %v470_v57, 0.0 }
 0x166   : > { %v475_v60 = vpop.f32.mrb[2].mxu0  ;;  %v565_v61 = vmax.f32 %v472_v59, 0.0 }
 0x167   : > { %v476_v63 = vadd.f32 %v475_v60, %v1726_v54  ;;  %v477_v1 = vpop.f32.mrb[3].mxu0 }
 0x168   : > { %v478_v2 = vadd.f32 %v477_v1, %v1728_v55  ;;  %708 = vmatprep.mubr.f32.mxu1 %v565_v61 }
 0x169   : > { %709 = vmatmul.mubr.f32.vlgmr.msra.gmra.mrb[0].mxu1 %v564_v62  ;;  %v566_v5 = vmax.f32 %v476_v63, 0.0 }
 0x16a   : > { %v567_v3 = vmax.f32 %v478_v2, 0.0  ;;  %v481_v4 = vpop.f32.mrb[4].mxu0 }
 0x16b   : > { %v482_v6 = vadd.f32 %v481_v4, %v1726_v54  ;;  %v483_v7 = vpop.f32.mrb[5].mxu0 }
 0x16c   : > { %v484_v8 = vadd.f32 %v483_v7, %v1728_v55  ;;  %713 = vmatprep.mubr.f32.mxu1 %v567_v3 }
 0x16d   : > { %714 = vmatmul.mubr.f32.gmra.mrb[2].mxu1 %v566_v5  ;;  %v568_v11 = vmax.f32 %v482_v6, 0.0 }
 0x16e   : > { %v569_v9 = vmax.f32 %v484_v8, 0.0  ;;  %v487_v10 = vpop.f32.mrb[6].mxu0 }
 0x16f   : > { %v488_v12 = vadd.f32 %v487_v10, %v1726_v54  ;;  %v489_v13 = vpop.f32.mrb[7].mxu0 }
 0x170   : > { %v490_v14 = vadd.f32 %v489_v13, %v1728_v55  ;;  %718 = vmatprep.mubr.f32.mxu1 %v569_v9 }
 0x171   : > { %719 = vmatmul.mubr.f32.gmra.mrb[4].mxu1 %v568_v11  ;;  %v570_v17 = vmax.f32 %v488_v12, 0.0 }
 0x172   : > { %v571_v15 = vmax.f32 %v490_v14, 0.0  ;;  %v493_v16 = vpop.f32.mrb[8].mxu0 }
 0x173   : > { %v494_v18 = vadd.f32 %v493_v16, %v1726_v54  ;;  %v495_v19 = vpop.f32.mrb[9].mxu0 }
 0x174   : > { %v496_v20 = vadd.f32 %v495_v19, %v1728_v55  ;;  %723 = vmatprep.mubr.f32.mxu1 %v571_v15 }
 0x175   : > { %724 = vmatmul.mubr.f32.gmra.mrb[6].mxu1 %v570_v17  ;;  %v572_v23 = vmax.f32 %v494_v18, 0.0 }
 0x176   : > { %v573_v21 = vmax.f32 %v496_v20, 0.0  ;;  %v499_v22 = vpop.f32.mrb[10].mxu0 }
 0x177   : > { %v500_v24 = vadd.f32 %v499_v22, %v1726_v54  ;;  %v501_v25 = vpop.f32.mrb[11].mxu0 }
 0x178   : > { %v502_v26 = vadd.f32 %v501_v25, %v1728_v55  ;;  %728 = vmatprep.mubr.f32.mxu1 %v573_v21 }
 0x179   : > { %729 = vmatmul.mubr.f32.gmra.mrb[8].mxu1 %v572_v23  ;;  %v574_v29 = vmax.f32 %v500_v24, 0.0 }
 0x17a   : > { %v575_v27 = vmax.f32 %v502_v26, 0.0  ;;  %v505_v28 = vpop.f32.mrb[12].mxu0 }
 0x17b   : > { %v506_v30 = vadd.f32 %v505_v28, %v1726_v54  ;;  %v507_v31 = vpop.f32.mrb[13].mxu0 }
 0x17c   : > { %v508_v32 = vadd.f32 %v507_v31, %v1728_v55  ;;  %733 = vmatprep.mubr.f32.mxu1 %v575_v27 }
 0x17d   : > { %734 = vmatmul.mubr.f32.gmra.mrb[10].mxu1 %v574_v29  ;;  %v576_v35 = vmax.f32 %v506_v30, 0.0  ;;  %v1765_v29 = vld [vmem:[%s1863_s4] ss:$0 sm:$0xff] }
 0x17e   : > { %v577_v33 = vmax.f32 %v508_v32, 0.0  ;;  %v511_v34 = vpop.f32.mrb[14].mxu0 }
 0x17f   : > { %v512_v36 = vadd.f32 %v511_v34, %v1726_v54  ;;  %v513_v37 = vpop.f32.mrb[15].mxu0 }
 0x180   : > { %v514_v38 = vadd.f32 %v513_v37, %v1728_v55  ;;  %738 = vmatprep.mubr.f32.mxu1 %v577_v33 }
 0x181   : > { %739 = vmatmul.mubr.f32.gmra.mrb[12].mxu1 %v576_v35  ;;  %v578_v41 = vmax.f32 %v512_v36, 0.0 }
 0x182   : > { %v579_v39 = vmax.f32 %v514_v38, 0.0  ;;  %v517_v40 = vpop.f32.mrb[16].mxu0 }
 0x183   : > { %v518_v42 = vadd.f32 %v517_v40, %v1726_v54  ;;  %v519_v43 = vpop.f32.mrb[17].mxu0 }
 0x184   : > { %v520_v44 = vadd.f32 %v519_v43, %v1728_v55  ;;  %743 = vmatprep.mubr.f32.mxu1 %v579_v39 }
 0x185   : > { %744 = vmatmul.mubr.f32.gmra.mrb[14].mxu1 %v578_v41  ;;  %v580_v47 = vmax.f32 %v518_v42, 0.0 }
 0x186   : > { %v581_v45 = vmax.f32 %v520_v44, 0.0  ;;  %v523_v46 = vpop.f32.mrb[18].mxu0 }
 0x187   : > { %v524_v48 = vadd.f32 %v523_v46, %v1726_v54  ;;  %v525_v49 = vpop.f32.mrb[19].mxu0 }
 0x188   : > { %v526_v50 = vadd.f32 %v525_v49, %v1728_v55  ;;  %748 = vmatprep.mubr.f32.mxu1 %v581_v45 }
 0x189   : > { %749 = vmatmul.mubr.f32.gmra.mrb[16].mxu1 %v580_v47  ;;  %v582_v0 = vmax.f32 %v524_v48, 0.0 }
 0x18a   : > { %v583_v51 = vmax.f32 %v526_v50, 0.0  ;;  %v529_v52 = vpop.f32.mrb[20].mxu0 }
 0x18b   : > { %v530_v53 = vadd.f32 %v529_v52, %v1726_v54  ;;  %v531_v56 = vpop.f32.mrb[21].mxu0 }
 0x18c   : > { %v532_v57 = vadd.f32 %v531_v56, %v1728_v55  ;;  %753 = vmatprep.mubr.f32.mxu1 %v583_v51 }
 0x18d   : > { %754 = vmatmul.mubr.f32.gmra.mrb[18].mxu1 %v582_v0  ;;  %v584_v60 = vmax.f32 %v530_v53, 0.0 }
 0x18e   : > { %v585_v58 = vmax.f32 %v532_v57, 0.0  ;;  %v535_v59 = vpop.f32.mrb[22].mxu0 }
 0x18f   : > { %v536_v61 = vadd.f32 %v535_v59, %v1726_v54  ;;  %v537_v62 = vpop.f32.mrb[23].mxu0 }
 0x190   : > { %v538_v63 = vadd.f32 %v537_v62, %v1728_v55  ;;  %758 = vmatprep.mubr.f32.mxu1 %v585_v58 }
 0x191   : > { %759 = vmatmul.mubr.f32.gmra.mrb[20].mxu1 %v584_v60  ;;  %v586_v3 = vmax.f32 %v536_v61, 0.0 }
 0x192   : > { %v587_v1 = vmax.f32 %v538_v63, 0.0  ;;  %v541_v2 = vpop.f32.mrb[24].mxu0 }
 0x193   : > { %v542_v4 = vadd.f32 %v541_v2, %v1726_v54  ;;  %v543_v5 = vpop.f32.mrb[25].mxu0 }
 0x194   : > { %v544_v6 = vadd.f32 %v543_v5, %v1728_v55  ;;  %763 = vmatprep.mubr.f32.mxu1 %v587_v1 }
 0x195   : > { %764 = vmatmul.mubr.f32.gmra.mrb[22].mxu1 %v586_v3  ;;  %v588_v9 = vmax.f32 %v542_v4, 0.0 }
 0x196   : > { %v589_v7 = vmax.f32 %v544_v6, 0.0  ;;  %v547_v8 = vpop.f32.mrb[26].mxu0 }
 0x197   : > { %v548_v10 = vadd.f32 %v547_v8, %v1726_v54  ;;  %v549_v11 = vpop.f32.mrb[27].mxu0 }
 0x198   : > { %v550_v12 = vadd.f32 %v549_v11, %v1728_v55  ;;  %768 = vmatprep.mubr.f32.mxu1 %v589_v7 }
 0x199   : > { %769 = vmatmul.mubr.f32.gmra.mrb[24].mxu1 %v588_v9  ;;  %v590_v15 = vmax.f32 %v548_v10, 0.0 }
 0x19a   : > { %v591_v13 = vmax.f32 %v550_v12, 0.0  ;;  %v553_v14 = vpop.f32.mrb[28].mxu0 }
 0x19b   : > { %v554_v16 = vadd.f32 %v553_v14, %v1726_v54  ;;  %v555_v17 = vpop.f32.mrb[29].mxu0 }
 0x19c   : > { %v556_v18 = vadd.f32 %v555_v17, %v1728_v55  ;;  %773 = vmatprep.mubr.f32.mxu1 %v591_v13 }
 0x19d   : > { %774 = vmatmul.mubr.f32.gmra.mrb[26].mxu1 %v590_v15  ;;  %v592_v21 = vmax.f32 %v554_v16, 0.0 }
 0x19e   : > { %v593_v19 = vmax.f32 %v556_v18, 0.0  ;;  %v559_v20 = vpop.f32.mrb[30].mxu0 }
 0x19f   : > { %v560_v22 = vadd.f32 %v559_v20, %v1726_v54  ;;  %v561_v23 = vpop.f32.mrb[31].mxu0 }
 0x1a0   : > { %v562_v24 = vadd.f32 %v561_v23, %v1728_v55  ;;  %778 = vmatprep.mubr.f32.mxu1 %v593_v19 }
 0x1a1   : > { %779 = vmatmul.mubr.f32.gmra.mrb[28].mxu1 %v592_v21  ;;  %v594_v26 = vmax.f32 %v560_v22, 0.0 }
 0x1a2   : > { %v595_v25 = vmax.f32 %v562_v24, 0.0 }
 0x1a4   : > { %783 = vmatprep.mubr.f32.mxu1 %v595_v25 }
 0x1a5   : > { %784 = vmatmul.mubr.f32.gmra.mrb[30].mxu1 %v594_v26 }
 0x23c   : > { %v1064_v27 = vpop.f32.mrb[0].mxu1 }
 0x23d   : > { %v1065_v28 = vpop.f32.mrb[1].mxu1 }
 0x23e   : > { %v1066_v30 = vadd.f32 %v1065_v28, %v1064_v27 }
 0x240   : > { %v847_v54 = vadd.f32 %v1066_v30, %v1765_v29  ;;  %v1067_v31 = vpop.f32.mrb[2].mxu1 }
 0x241   : > { %v1068_v32 = vpop.f32.mrb[3].mxu1 }
 0x242   : > { %863 = vst [vmem:[%s1770_s9] sm:$0xff] %v847_v54  ;;  %v1069_v55 = vadd.f32 %v1068_v32, %v1067_v31 }
 0x244   : > { %v848_v33 = vadd.f32 %v1069_v55, %v1765_v29  ;;  %v1070_v34 = vpop.f32.mrb[4].mxu1 }
 0x245   : > { %v1071_v35 = vpop.f32.mrb[5].mxu1 }
 0x246   : > { %864 = vst [vmem:[%s1770_s9 + $0x8] sm:$0xff] %v848_v33  ;;  %v1072_v36 = vadd.f32 %v1071_v35, %v1070_v34 }
 0x248   : > { %v849_v37 = vadd.f32 %v1072_v36, %v1765_v29  ;;  %v1073_v38 = vpop.f32.mrb[6].mxu1 }
 0x249   : > { %v1074_v39 = vpop.f32.mrb[7].mxu1 }
 0x24a   : > { %865 = vst [vmem:[%s1770_s9 + $0x10] sm:$0xff] %v849_v37  ;;  %v1075_v40 = vadd.f32 %v1074_v39, %v1073_v38 }
 0x24c   : > { %v850_v41 = vadd.f32 %v1075_v40, %v1765_v29  ;;  %v1076_v42 = vpop.f32.mrb[8].mxu1 }
 0x24d   : > { %v1077_v43 = vpop.f32.mrb[9].mxu1 }
 0x24e   : > { %866 = vst [vmem:[%s1770_s9 + $0x18] sm:$0xff] %v850_v41  ;;  %v1078_v44 = vadd.f32 %v1077_v43, %v1076_v42 }
 0x250   : > { %v851_v45 = vadd.f32 %v1078_v44, %v1765_v29  ;;  %v1079_v46 = vpop.f32.mrb[10].mxu1 }
 0x251   : > { %v1080_v47 = vpop.f32.mrb[11].mxu1 }
 0x252   : > { %867 = vst [vmem:[%s1770_s9 + $0x20] sm:$0xff] %v851_v45  ;;  %v1081_v48 = vadd.f32 %v1080_v47, %v1079_v46 }
 0x254   : > { %v852_v49 = vadd.f32 %v1081_v48, %v1765_v29  ;;  %v1082_v50 = vpop.f32.mrb[12].mxu1 }
 0x255   : > { %v1083_v51 = vpop.f32.mrb[13].mxu1 }
 0x256   : > { %868 = vst [vmem:[%s1770_s9 + $0x28] sm:$0xff] %v852_v49  ;;  %v1084_v52 = vadd.f32 %v1083_v51, %v1082_v50 }
 0x258   : > { %v853_v0 = vadd.f32 %v1084_v52, %v1765_v29  ;;  %v1085_v53 = vpop.f32.mrb[14].mxu1 }
 0x259   : > { %v1086_v56 = vpop.f32.mrb[15].mxu1 }
 0x25a   : > { %869 = vst [vmem:[%s1770_s9 + $0x30] sm:$0xff] %v853_v0  ;;  %v1087_v57 = vadd.f32 %v1086_v56, %v1085_v53 }
 0x25c   : > { %v854_v58 = vadd.f32 %v1087_v57, %v1765_v29  ;;  %v1088_v59 = vpop.f32.mrb[16].mxu1 }
 0x25d   : > { %v1089_v60 = vpop.f32.mrb[17].mxu1 }
 0x25e   : > { %870 = vst [vmem:[%s1770_s9 + $0x38] sm:$0xff] %v854_v58  ;;  %v1090_v61 = vadd.f32 %v1089_v60, %v1088_v59 }
 0x260   : > { %v855_v62 = vadd.f32 %v1090_v61, %v1765_v29  ;;  %v1091_v63 = vpop.f32.mrb[18].mxu1 }
 0x261   : > { %v1092_v1 = vpop.f32.mrb[19].mxu1 }
 0x262   : > { %871 = vst [vmem:[%s1770_s9 + $0x40] sm:$0xff] %v855_v62  ;;  %v1093_v2 = vadd.f32 %v1092_v1, %v1091_v63 }
 0x264   : > { %v856_v3 = vadd.f32 %v1093_v2, %v1765_v29  ;;  %v1094_v4 = vpop.f32.mrb[20].mxu1 }
 0x265   : > { %v1095_v5 = vpop.f32.mrb[21].mxu1 }
 0x266   : > { %872 = vst [vmem:[%s1770_s9 + $0x48] sm:$0xff] %v856_v3  ;;  %v1096_v6 = vadd.f32 %v1095_v5, %v1094_v4 }
 0x268   : > { %v857_v7 = vadd.f32 %v1096_v6, %v1765_v29  ;;  %v1097_v8 = vpop.f32.mrb[22].mxu1 }
 0x269   : > { %v1098_v9 = vpop.f32.mrb[23].mxu1 }
 0x26a   : > { %873 = vst [vmem:[%s1770_s9 + $0x50] sm:$0xff] %v857_v7  ;;  %v1099_v10 = vadd.f32 %v1098_v9, %v1097_v8 }
 0x26c   : > { %v858_v11 = vadd.f32 %v1099_v10, %v1765_v29  ;;  %v1100_v12 = vpop.f32.mrb[24].mxu1 }
 0x26d   : > { %v1101_v13 = vpop.f32.mrb[25].mxu1 }
 0x26e   : > { %874 = vst [vmem:[%s1770_s9 + $0x58] sm:$0xff] %v858_v11  ;;  %v1102_v14 = vadd.f32 %v1101_v13, %v1100_v12 }
 0x270   : > { %v859_v15 = vadd.f32 %v1102_v14, %v1765_v29  ;;  %v1103_v16 = vpop.f32.mrb[26].mxu1 }
 0x271   : > { %v1104_v17 = vpop.f32.mrb[27].mxu1 }
 0x272   : > { %875 = vst [vmem:[%s1770_s9 + $0x60] sm:$0xff] %v859_v15  ;;  %v1105_v18 = vadd.f32 %v1104_v17, %v1103_v16 }
 0x274   : > { %v860_v19 = vadd.f32 %v1105_v18, %v1765_v29  ;;  %v1106_v20 = vpop.f32.mrb[28].mxu1 }
 0x275   : > { %v1107_v21 = vpop.f32.mrb[29].mxu1 }
 0x276   : > { %876 = vst [vmem:[%s1770_s9 + $0x68] sm:$0xff] %v860_v19  ;;  %v1108_v22 = vadd.f32 %v1107_v21, %v1106_v20 }
 0x278   : > { %v861_v23 = vadd.f32 %v1108_v22, %v1765_v29  ;;  %v1109_v24 = vpop.f32.mrb[30].mxu1 }
 0x279   : > { %v1110_v25 = vpop.f32.mrb[31].mxu1 }
 0x27a   : > { %877 = vst [vmem:[%s1770_s9 + $0x70] sm:$0xff] %v861_v23  ;;  %v1111_v26 = vadd.f32 %v1110_v25, %v1109_v24 }
 0x27c   : > { %v862_v27 = vadd.f32 %v1111_v26, %v1765_v29 }
 0x27e   : > { %878 = vst [vmem:[%s1770_s9 + $0x78] sm:$0xff] %v862_v27 }
 0x27f   : > { %1365 = shalt.err (!%p1362_p11)
}
 0x280   : > { %s1366_s26 = scalar_lea.hbm %s1806_s7, 2048  ;;  %s1370_s6 = scalar_lea.hbm %s1864_s5, 4096 }
 0x281   : > { %p1367_p0 = scmp.ne.s32.totalorder %s1806_s7, %s1366_s26  ;;  %p1371_p6 = scmp.lt.u32.totalorder %s1806_s7, %s1864_s5 }
 0x282   : > { %p1372_p7 = scmp.lt.u32.totalorder %s1370_s6, %s1366_s26  ;;  %p1374_p8 = scmp.lt.u32.totalorder %s1366_s26, %s1806_s7 }
 0x283   : > { %p1368_p4 = pnand %p1367_p0, %p1881_p12 }
 0x284   : > { %p1373_p2 = por %p1372_p7, %p1371_p6 }
 0x285   : > { %p1369_p13 = pneg %p1368_p4 }
 0x286   : > { %p1375_p1 = por %p1374_p8, %p1373_p2 }
 0x288   : > { %p1376_p10 = pnand %p1375_p1, %p1369_p13 }
 0x28a   : > { %1379 = shalt.err (!%p1376_p10)
}
 0x28b   : > { %s1449_s10 = smov 128   ;;  %s1450_s16 = smov 8  }
 0x28c   : > { %1186 = dma.vmem_to_hbm [thread:$0]  (%p1881_p12), %s1808_s13, 2048, %s1806_s7, %s880_s14, %s1449_s10, %s1449_s10, %s1450_s16  }
 0x28d PF: > { %s908_s27 = sand.u32 1, %s1418_s18   ;;  %p1882_p3 = scmp.ne.s32.totalorder %s1873_s29, 0 }
 0x28e   : > { %p1883_p5 = scmp.ge.s32.totalorder %s1438_s23, 2  ;;  %s909_s21 = scalar_lea.sflag [#allocation5], %s908_s27 }
 0x290   : > { %p1200_p9 = pnand %p1883_p5, %p1882_p3 }
 0x292   : > { %1413 = dma.done.wait (!%p1200_p9), %s909_s21, 2048  }
 0x293   : > { %1415 = vsyncadd (!%p1200_p9), %s909_s21, 4294965248  ;;  %s22_s23 = sadd.s32 1, %s1438_s23   ;;  %s1884_s18 = smov %s1422_s19 }
 0x294   : > { %p19_p11 = scmp.ge.s32.totalorder %s22_s23, 4   ;;  %s1885_s19 = smov %s1426_s20 }
 0x295   : > { %s1886_s20 = smov %s1626_s17  ;;  %s1887_s21 = smov %s1434_s22 }
 0x296   : > { %s1888_s22 = smov %s1890_s12  ;;  %21 = sbr.rel (!%p19_p11) target bundleno = 7 (0x7), region = 106 }
 0x29d   :  { %914 = vsyncpa [#allocation4], 1 }
 0x29e   :  { %916 = vsyncpa [#allocation4 + $0x1], 1 }
 0x29f   :  { %917 = vsyncpa [#allocation7], 1 }
 0x2a0   :  { %918 = vsyncpa [#allocation5], 1 }
 0x2a1   :  { %920 = vsyncpa [#allocation5 + $0x1], 1 }

</bundles_post_ra>
